<compile_context>
chip_gen: v5e
topology: v5e:2x2
jax: 0.10.0
libtpu: 0.0.40
codegen_flags: <defaults>
</compile_context>

<pallas_src>
import functools

import jax
import jax.numpy as jnp
from jax.experimental import pallas as pl
from jax.experimental.pallas import tpu as pltpu


def _kl_loss_kernel(inp_ref, tgt_ref, sm_ref, w_ref, out_ref, *,
                    angle_weight, lambda_V, s0):
    # All refs are (3, TILE_N): rows = (x, y, theta) channels, lanes = anchors.
    inp = inp_ref[...]
    tgt_raw = tgt_ref[...]
    tgt = jnp.where(jnp.isnan(tgt_raw), inp, tgt_raw)
    diff = inp - tgt                       # rows 0,1: xy diff; row 2: theta diff
    s = sm_ref[...]
    em = jnp.exp(-s)                       # shared by both loss branches

    # ---- rows 0,1 : kl_loss_l2 -> 0.5 * (exp(-s) * diff^2 + s) -------------
    loss_l2 = 0.5 * (em * diff * diff + s)

    # ---- row 2 : von-Mises KL (limit_period=False) --------------------------
    #   loss = log(I0(e^{-s})) - e^{-s} * cos(diff) + lambda_V * elu(s - s0)
    # log(I0(x)) via A&S 9.8.1 / 9.8.2 polynomials, kept in log domain:
    #   x < 3.75 : log(poly_small(t)),            t = x / 3.75
    #   x >= 3.75: log(poly_large(u) * rsqrt(x)) + x,  u = 3.75 / x
    t = em * (1.0 / 3.75)
    t2 = t * t
    poly_small = 1.0 + t2 * (3.5156229 + t2 * (3.0899424 + t2 * (1.2067492
                 + t2 * (0.2659732 + t2 * (0.0360768 + t2 * 0.0045813)))))
    xs = jnp.maximum(em, 3.75)
    u = 3.75 / xs
    poly_large = (0.39894228 + u * (0.01328592 + u * (0.00225319 + u * (-0.00157565
                 + u * (0.00916281 + u * (-0.02057706 + u * (0.02635537
                 + u * (-0.01647633 + u * 0.00392377))))))))
    is_small = em < 3.75
    log_arg = jnp.where(is_small, poly_small, poly_large * jax.lax.rsqrt(xs))
    log_i0 = jnp.log(log_arg) + jnp.where(is_small, 0.0, em)

    z = s - s0
    elu = jnp.where(z > 0.0, z, jnp.exp(jnp.minimum(z, 0.0)) - 1.0)
    loss_vm = angle_weight * (log_i0 - em * jnp.cos(diff) + lambda_V * elu)

    # Select per-row branch (sublane iota) and do one dense store.
    row = jax.lax.broadcasted_iota(jnp.int32, s.shape, 0)
    loss = jnp.where(row < 2, loss_l2, loss_vm)
    out_ref[...] = loss * w_ref[...]


def kl_loss(inp, tgt, sm, weights, *, angle_weight=1.0, lambda_V=1.0, s0=1.0,
            tile_n=2048):
    """Pallas wrapper. inp/tgt: [N, >=8]; sm/weights: [N, 3] -> loss [N, 3]."""
    n, d = inp.shape
    assert d >= 8, "box code needs index 7 for the angle channel"
    ud = sm.shape[1]
    assert ud == 3, "only uncertainty_dim == 3 implemented"
    assert weights.shape == (n, ud)

    # Channel-major, lane-dense slabs; only the 3 used box-code channels are
    # gathered (cuts HBM traffic for input/target by ~60%).
    idx = jnp.array([0, 1, 7], dtype=jnp.int32)
    inp_t = jnp.take(inp, idx, axis=1).T.astype(jnp.float32)     # (3, N)
    tgt_t = jnp.take(tgt, idx, axis=1).T.astype(jnp.float32)     # (3, N)
    sm_t = sm.T.astype(jnp.float32)                              # (3, N)
    w_t = weights.T.astype(jnp.float32)                          # (3, N)

    # Lane tile: multiple of 128, capped at n rounded up to 128 (no wrapper pad;
    # Pallas masks the ragged tail block).
    n_lanes = pl.cdiv(n, 128) * 128
    tile = max(128, min(int(tile_n), n_lanes))
    grid = (pl.cdiv(n, tile),)

    kernel = functools.partial(_kl_loss_kernel, angle_weight=angle_weight,
                               lambda_V=lambda_V, s0=s0)
    spec = pl.BlockSpec((ud, tile), lambda i: (0, i))

    out_t = pl.pallas_call(
        kernel,
        out_shape=jax.ShapeDtypeStruct((ud, n), jnp.float32),
        grid=grid,
        in_specs=[spec, spec, spec, spec],
        out_specs=spec,
        compiler_params=pltpu.CompilerParams(dimension_semantics=("parallel",)),
    )(inp_t, tgt_t, sm_t, w_t)
    return out_t.T                                               # (N, 3)


def kl_loss_ref(inp, tgt, sm, weights, *, angle_weight=1.0, lambda_V=1.0, s0=1.0):
    """Pure-JAX reference mirroring the PyTorch forward (uncertainty_dim=3)."""
    tgt = jnp.where(jnp.isnan(tgt), inp, tgt)
    xy_diff = inp[..., :2] - tgt[..., :2]
    loss1 = 0.5 * (jnp.exp(-sm[..., :2]) * xy_diff ** 2 + sm[..., :2])
    theta_diff = inp[..., 7:8] - tgt[..., 7:8]
    s = sm[..., 2:3]
    em = jnp.exp(-s)
    loss2 = angle_weight * (jnp.log(jax.scipy.special.i0e(em) * jnp.exp(em))
                            - em * jnp.cos(theta_diff)
                            + lambda_V * jax.nn.elu(s - s0))
    loss = jnp.concatenate([loss1, loss2], axis=-1)
    return loss * weights


if __name__ == "__main__":
    # TODO(synk): uncertainty_dim in {2, 4, 7}, xy_loss_type='l1', angle 'l2',
    # and limit_period=True (uses .detach()) branches are not wired up here;
    # the in-kernel NaN-warning prints of the PyTorch module are omitted.
    N, D, UD = 333, 8, 3   # non-multiple of 128 to exercise the ragged tail
    key = jax.random.PRNGKey(0)
    k1, k2, k3, k4, k5 = jax.random.split(key, 5)

    inp = jax.random.normal(k1, (N, D), jnp.float32)
    tgt = jax.random.normal(k2, (N, D), jnp.float32)
    # Inject some NaNs in target to exercise the torch.where(isnan, ...) path.
    nan_mask = jax.random.bernoulli(k5, 0.1, (N, D))
    tgt = jnp.where(nan_mask, jnp.nan, tgt)
    sm = jax.random.normal(k3, (N, UD), jnp.float32)
    weights = jax.random.uniform(k4, (N, UD), jnp.float32)

    out = kl_loss(inp, tgt, sm, weights, angle_weight=1.0, lambda_V=1.0, s0=1.0)
    out = jax.block_until_ready(out)

    ref = kl_loss_ref(inp, tgt, sm, weights, angle_weight=1.0, lambda_V=1.0, s0=1.0)
    assert out.shape == (N, UD) and out.dtype == jnp.float32
    assert not bool(jnp.any(jnp.isnan(out)))
    assert bool(jnp.allclose(out, ref, rtol=1e-4, atol=1e-5)), "mismatch vs reference"

    print("KERNEL_OK")
</pallas_src>

<mosaic_0001>
module attributes {stable_mosaic.version = 11 : i64} {
  func.func @_kl_loss_kernel(%arg0: i32, %arg1: memref<3x384xf32, #tpu.memory_space<vmem>>, %arg2: memref<3x384xf32, #tpu.memory_space<vmem>>, %arg3: memref<3x384xf32, #tpu.memory_space<vmem>>, %arg4: memref<3x384xf32, #tpu.memory_space<vmem>>, %arg5: memref<3x384xf32, #tpu.memory_space<vmem>>) attributes {dimension_semantics = [#tpu.dimension_semantics<parallel>], iteration_bounds = array<i64: 1>, scalar_prefetch = 0 : i64, scratch_operands = 0 : i64, tpu.core_type = #tpu.core_type<tc>, window_params = [{transform_indices = @transform_0, window_bounds = array<i64: 3, 384>}, {transform_indices = @transform_1, window_bounds = array<i64: 3, 384>}, {transform_indices = @transform_2, window_bounds = array<i64: 3, 384>}, {transform_indices = @transform_3, window_bounds = array<i64: 3, 384>}, {transform_indices = @transform_4, window_bounds = array<i64: 3, 384>}]} {
    %c0 = arith.constant 0 : index
    %c0_0 = arith.constant 0 : index
    %0 = vector.load %arg1[%c0, %c0_0] : memref<3x384xf32, #tpu.memory_space<vmem>>, vector<3x384xf32>
    %c0_1 = arith.constant 0 : index
    %c0_2 = arith.constant 0 : index
    %1 = vector.load %arg2[%c0_1, %c0_2] : memref<3x384xf32, #tpu.memory_space<vmem>>, vector<3x384xf32>
    %2 = arith.cmpf one, %1, %1 : vector<3x384xf32>
    %3 = arith.select %2, %0, %1 : vector<3x384xi1>, vector<3x384xf32>
    %4 = arith.subf %0, %3 : vector<3x384xf32>
    %c0_3 = arith.constant 0 : index
    %c0_4 = arith.constant 0 : index
    %5 = vector.load %arg3[%c0_3, %c0_4] : memref<3x384xf32, #tpu.memory_space<vmem>>, vector<3x384xf32>
    %cst = arith.constant 0.000000e+00 : f32
    %6 = vector.broadcast %cst : f32 to vector<3x384xf32>
    %7 = arith.subf %6, %5 : vector<3x384xf32>
    %8 = math.exp %7 : vector<3x384xf32>
    %9 = arith.mulf %8, %4 : vector<3x384xf32>
    %10 = arith.mulf %9, %4 : vector<3x384xf32>
    %11 = arith.addf %10, %5 : vector<3x384xf32>
    %cst_5 = arith.constant 5.000000e-01 : f32
    %12 = vector.broadcast %cst_5 : f32 to vector<3x384xf32>
    %13 = arith.mulf %12, %11 : vector<3x384xf32>
    %cst_6 = arith.constant 0.266666681 : f32
    %14 = vector.broadcast %cst_6 : f32 to vector<3x384xf32>
    %15 = arith.mulf %8, %14 : vector<3x384xf32>
    %16 = arith.mulf %15, %15 : vector<3x384xf32>
    %cst_7 = arith.constant 4.581300e-03 : f32
    %17 = vector.broadcast %cst_7 : f32 to vector<3x384xf32>
    %18 = arith.mulf %16, %17 : vector<3x384xf32>
    %cst_8 = arith.constant 3.607680e-02 : f32
    %19 = vector.broadcast %cst_8 : f32 to vector<3x384xf32>
    %20 = arith.addf %19, %18 : vector<3x384xf32>
    %21 = arith.mulf %16, %20 : vector<3x384xf32>
    %cst_9 = arith.constant 0.26597321 : f32
    %22 = vector.broadcast %cst_9 : f32 to vector<3x384xf32>
    %23 = arith.addf %22, %21 : vector<3x384xf32>
    %24 = arith.mulf %16, %23 : vector<3x384xf32>
    %cst_10 = arith.constant 1.2067492 : f32
    %25 = vector.broadcast %cst_10 : f32 to vector<3x384xf32>
    %26 = arith.addf %25, %24 : vector<3x384xf32>
    %27 = arith.mulf %16, %26 : vector<3x384xf32>
    %cst_11 = arith.constant 3.08994246 : f32
    %28 = vector.broadcast %cst_11 : f32 to vector<3x384xf32>
    %29 = arith.addf %28, %27 : vector<3x384xf32>
    %30 = arith.mulf %16, %29 : vector<3x384xf32>
    %cst_12 = arith.constant 3.51562285 : f32
    %31 = vector.broadcast %cst_12 : f32 to vector<3x384xf32>
    %32 = arith.addf %31, %30 : vector<3x384xf32>
    %33 = arith.mulf %16, %32 : vector<3x384xf32>
    %cst_13 = arith.constant 1.000000e+00 : f32
    %34 = vector.broadcast %cst_13 : f32 to vector<3x384xf32>
    %35 = arith.addf %34, %33 : vector<3x384xf32>
    %cst_14 = arith.constant 3.750000e+00 : f32
    %36 = vector.broadcast %cst_14 : f32 to vector<3x384xf32>
    %37 = arith.maximumf %8, %36 : vector<3x384xf32>
    %cst_15 = arith.constant 3.750000e+00 : f32
    %38 = vector.broadcast %cst_15 : f32 to vector<3x384xf32>
    %39 = arith.divf %38, %37 : vector<3x384xf32>
    %cst_16 = arith.constant 3.923770e-03 : f32
    %40 = vector.broadcast %cst_16 : f32 to vector<3x384xf32>
    %41 = arith.mulf %39, %40 : vector<3x384xf32>
    %cst_17 = arith.constant -0.0164763294 : f32
    %42 = vector.broadcast %cst_17 : f32 to vector<3x384xf32>
    %43 = arith.addf %42, %41 : vector<3x384xf32>
    %44 = arith.mulf %39, %43 : vector<3x384xf32>
    %cst_18 = arith.constant 0.0263553709 : f32
    %45 = vector.broadcast %cst_18 : f32 to vector<3x384xf32>
    %46 = arith.addf %45, %44 : vector<3x384xf32>
    %47 = arith.mulf %39, %46 : vector<3x384xf32>
    %cst_19 = arith.constant -0.0205770601 : f32
    %48 = vector.broadcast %cst_19 : f32 to vector<3x384xf32>
    %49 = arith.addf %48, %47 : vector<3x384xf32>
    %50 = arith.mulf %39, %49 : vector<3x384xf32>
    %cst_20 = arith.constant 0.00916280969 : f32
    %51 = vector.broadcast %cst_20 : f32 to vector<3x384xf32>
    %52 = arith.addf %51, %50 : vector<3x384xf32>
    %53 = arith.mulf %39, %52 : vector<3x384xf32>
    %cst_21 = arith.constant -1.575650e-03 : f32
    %54 = vector.broadcast %cst_21 : f32 to vector<3x384xf32>
    %55 = arith.addf %54, %53 : vector<3x384xf32>
    %56 = arith.mulf %39, %55 : vector<3x384xf32>
    %cst_22 = arith.constant 2.253190e-03 : f32
    %57 = vector.broadcast %cst_22 : f32 to vector<3x384xf32>
    %58 = arith.addf %57, %56 : vector<3x384xf32>
    %59 = arith.mulf %39, %58 : vector<3x384xf32>
    %cst_23 = arith.constant 0.01328592 : f32
    %60 = vector.broadcast %cst_23 : f32 to vector<3x384xf32>
    %61 = arith.addf %60, %59 : vector<3x384xf32>
    %62 = arith.mulf %39, %61 : vector<3x384xf32>
    %cst_24 = arith.constant 0.398942292 : f32
    %63 = vector.broadcast %cst_24 : f32 to vector<3x384xf32>
    %64 = arith.addf %63, %62 : vector<3x384xf32>
    %cst_25 = arith.constant 3.750000e+00 : f32
    %65 = vector.broadcast %cst_25 : f32 to vector<3x384xf32>
    %66 = arith.cmpf olt, %8, %65 : vector<3x384xf32>
    %67 = math.rsqrt %37 : vector<3x384xf32>
    %68 = arith.mulf %64, %67 : vector<3x384xf32>
    %69 = arith.select %66, %35, %68 : vector<3x384xi1>, vector<3x384xf32>
    %70 = math.log %69 : vector<3x384xf32>
    %cst_26 = arith.constant 0.000000e+00 : f32
    %71 = vector.broadcast %cst_26 : f32 to vector<3x384xf32>
    %72 = arith.select %66, %71, %8 : vector<3x384xi1>, vector<3x384xf32>
    %73 = arith.addf %70, %72 : vector<3x384xf32>
    %cst_27 = arith.constant 1.000000e+00 : f32
    %74 = vector.broadcast %cst_27 : f32 to vector<3x384xf32>
    %75 = arith.subf %5, %74 : vector<3x384xf32>
    %cst_28 = arith.constant 0.000000e+00 : f32
    %76 = vector.broadcast %cst_28 : f32 to vector<3x384xf32>
    %77 = arith.cmpf ogt, %75, %76 : vector<3x384xf32>
    %cst_29 = arith.constant 0.000000e+00 : f32
    %78 = vector.broadcast %cst_29 : f32 to vector<3x384xf32>
    %79 = arith.minimumf %75, %78 : vector<3x384xf32>
    %80 = math.exp %79 : vector<3x384xf32>
    %cst_30 = arith.constant 1.000000e+00 : f32
    %81 = vector.broadcast %cst_30 : f32 to vector<3x384xf32>
    %82 = arith.subf %80, %81 : vector<3x384xf32>
    %83 = arith.select %77, %75, %82 : vector<3x384xi1>, vector<3x384xf32>
    %84 = math.cos %4 : vector<3x384xf32>
    %85 = arith.mulf %8, %84 : vector<3x384xf32>
    %86 = arith.subf %73, %85 : vector<3x384xf32>
    %cst_31 = arith.constant 1.000000e+00 : f32
    %87 = vector.broadcast %cst_31 : f32 to vector<3x384xf32>
    %88 = arith.mulf %87, %83 : vector<3x384xf32>
    %89 = arith.addf %86, %88 : vector<3x384xf32>
    %cst_32 = arith.constant 1.000000e+00 : f32
    %90 = vector.broadcast %cst_32 : f32 to vector<3x384xf32>
    %91 = arith.mulf %90, %89 : vector<3x384xf32>
    %92 = tpu.iota {dimensions = array<i32: 0>} : vector<3x384xi32>
    %c2_i32 = arith.constant 2 : i32
    %93 = vector.broadcast %c2_i32 : i32 to vector<3x384xi32>
    %94 = arith.cmpi slt, %92, %93 : vector<3x384xi32>
    %95 = arith.select %94, %13, %91 : vector<3x384xi1>, vector<3x384xf32>
    %c0_33 = arith.constant 0 : index
    %c0_34 = arith.constant 0 : index
    %96 = vector.load %arg4[%c0_33, %c0_34] : memref<3x384xf32, #tpu.memory_space<vmem>>, vector<3x384xf32>
    %97 = arith.mulf %95, %96 : vector<3x384xf32>
    %c0_35 = arith.constant 0 : index
    %c0_36 = arith.constant 0 : index
    %98 = vector.load %arg5[%c0_35, %c0_36] : memref<3x384xf32, #tpu.memory_space<vmem>>, vector<3x384xf32>
    tpu.vector_store %arg5[%c0_35, %c0_36], %97 {strides = array<i32>} : memref<3x384xf32, #tpu.memory_space<vmem>>, vector<3x384xf32>,
    return
  }
  func.func @transform_0(%arg0: i32) -> (i32, i32) {
    %c0_i32 = arith.constant 0 : i32
    %c0_i32_0 = arith.constant 0 : i32
    return %c0_i32, %arg0 : i32, i32
  }
  func.func @transform_1(%arg0: i32) -> (i32, i32) {
    %c0_i32 = arith.constant 0 : i32
    %c0_i32_0 = arith.constant 0 : i32
    return %c0_i32, %arg0 : i32, i32
  }
  func.func @transform_2(%arg0: i32) -> (i32, i32) {
    %c0_i32 = arith.constant 0 : i32
    %c0_i32_0 = arith.constant 0 : i32
    return %c0_i32, %arg0 : i32, i32
  }
  func.func @transform_3(%arg0: i32) -> (i32, i32) {
    %c0_i32 = arith.constant 0 : i32
    %c0_i32_0 = arith.constant 0 : i32
    return %c0_i32, %arg0 : i32, i32
  }
  func.func @transform_4(%arg0: i32) -> (i32, i32) {
    %c0_i32 = arith.constant 0 : i32
    %c0_i32_0 = arith.constant 0 : i32
    return %c0_i32, %arg0 : i32, i32
  }
}

</mosaic_0001>

<bundles_post_ra>
// kernel: tpu_custom_call.1
= control target key start
LH: loop header
LB: loop body
LE: loop exit
PB: predicated region body
PF: predicated region fallthrough
CT: control target
= control target key end

     0   :  { %9 = vsyncpa [#allocation3], 0  ;;  %s1200_s0 = inlined_call_operand.hbm [shape: f32[3,333], index: 0, kind: input, shape index: {}]   ;;  %s1201_s1 = inlined_call_operand.hbm [shape: f32[3,333], index: 1, kind: input, shape index: {}]   ;;  %s1202_s2 = inlined_call_operand.hbm [shape: f32[3,333], index: 2, kind: input, shape index: {}]   ;;  %s1203_s3 = inlined_call_operand.hbm [shape: f32[3,333], index: 3, kind: input, shape index: {}]   ;;  %s1204_s4 = inlined_call_operand.hbm [shape: f32[3,333], index: 4, kind: output, shape index: {}]  }
   0x1   :  { %10 = vsyncpa [#allocation6], 0 }
   0x2   :  { %11 = vsyncpa [#allocation9], 0  ;;  %s29_s17 = sshll.u32 %s1201_s1, 4  ;;  %s30_s17 = int_to_ptr.hbm [resolvable:$true] %s29_s17 }
   0x3   :  { %12 = vsyncpa [#allocation4], 0  ;;  %s794_s18 = smov [#allocation5]   ;;  %s18_s22 = sshll.u32 %s1200_s0, 4  ;;  %s19_s22 = int_to_ptr.hbm [resolvable:$true] %s18_s22 }
   0x4   :  { %s31_s19 = sshll.u32 %s794_s18, 4  ;;  %s795_s23 = smov [#allocation2]   ;;  %s32_s19 = int_to_ptr.vmem [resolvable:$true] %s31_s19 }
   0x5   :  { %34 = dma.hbm_to_vmem [thread:$0]  %s30_s17, 192, %s32_s19, [#allocation6]  }
   0x6   :  { %s20_s24 = sshll.u32 %s795_s23, 4  ;;  %s40_s27 = sshll.u32 %s1202_s2, 4  ;;  %s21_s24 = int_to_ptr.vmem [resolvable:$true] %s20_s24  ;;  %s41_s27 = int_to_ptr.hbm [resolvable:$true] %s40_s27 }
   0x7   :  { %23 = dma.hbm_to_vmem [thread:$0]  %s19_s22, 192, %s21_s24, [#allocation3]  }
   0x8   :  { %s51_s29 = sshll.u32 %s1203_s3, 4  ;;  %s796_s30 = smov [#allocation7]   ;;  %s52_s29 = int_to_ptr.hbm [resolvable:$true] %s51_s29 }
   0x9   :  { %s42_s5 = sshll.u32 %s796_s30, 4  ;;  %s797_s0 = smov [#allocation8]   ;;  %s43_s5 = int_to_ptr.vmem [resolvable:$true] %s42_s5 }
   0xa   :  { %45 = dma.hbm_to_vmem [thread:$0]  %s41_s27, 192, %s43_s5, [#allocation6]  }
   0xb   :  { %s53_s6 = sshll.u32 %s797_s0, 4  ;;  %s54_s6 = int_to_ptr.vmem [resolvable:$true] %s53_s6 }
   0xc   :  { %56 = dma.hbm_to_vmem [thread:$0]  %s52_s29, 192, %s54_s6, [#allocation9]  }
   0xd   :  { %786 = dma.done.wait [#allocation3], 192  }
   0xe   :  { %787 = vsyncadd [#allocation3], 4294967104 }
   0xf   :  { %788 = dma.done.wait [#allocation6], 384  }
  0x10   :  { %789 = vsyncadd [#allocation6], 4294966912 }
  0x11   :  { %790 = dma.done.wait [#allocation9], 192  }
  0x12   :  { %791 = vsyncadd [#allocation9], 4294967104  ;;  %v73_v0 = vld [vmem:[#allocation2] sm:$0x77]  ;;  %v75_v1 = vld [vmem:[#allocation5] sm:$0x77] }
  0x13   :  { %v843_v2 = vld [vmem:[#allocation7] sm:$0x77]  ;;  %vm77_vm0 = vcmp.ne.f32.partialorder %v75_v1, %v75_v1  ;;  %v846_v5 = vld [vmem:[#allocation7 + $0x8] sm:$0x7]  ;;  %v76_v8 = vld [vmem:[#allocation5 + $0x8] sm:$0x7] }
  0x14   :  { %v85_v3 = vsub.f32 0.0, %v843_v2  ;;  %v79_v4 = vsel %vm77_vm0, %v73_v0, %v75_v1  ;;  %v86_v9 = vsub.f32 0.0, %v846_v5  ;;  %v74_v12 = vld [vmem:[#allocation2 + $0x8] sm:$0x7]  ;;  %vm78_vm1 = vcmp.ne.f32.partialorder %v76_v8, %v76_v8  ;;  %s805_s2 = smov [#allocation10]   ;;  %s612_s9 = sshll.u32 %s1204_s4, 4  ;;  %s613_s9 = int_to_ptr.hbm [resolvable:$true] %s612_s9 }
  0x15   :  { %v848_v6 = vsub.f32 %v73_v0, %v79_v4  ;;  %v80_v15 = vsel %vm78_vm1, %v74_v12, %v76_v8  ;;  %v798_v38 = vmov 683565275   ;;  %v799_v40 = vmov 2475754826   ;;  %s610_s3 = sshll.u32 %s805_s2, 4  ;;  %s611_s3 = int_to_ptr.vmem [resolvable:$true] %s610_s3 }
  0x16   :  { %v87_v7 = vmul.f32 1.442695, %v85_v3  ;;  %v89_v10 = vmul.f32 1.442695, %v86_v9  ;;  %v862_v22 = vsub.f32 %v74_v12, %v80_v15  ;;  %v800_v45 = vmov 2131351028  }
  0x17   :  { %v242_v11 = vand.u32 2139095040, %v848_v6  ;;  %v239_v13 = vand.u32 2147483647, %v848_v6  ;;  %v801_v51 = vmov 2102212464  }
  0x18   :  { %646 = vpow2.f32 %v87_v7  ;;  %v802_v54 = vmov 920167782   ;;  %v803_v63 = vmov 1326507024  }
  0x19   :  { %648 = vpow2.f32 %v89_v10  ;;  %v243_v14 = vshrl.u32 %v242_v11, 23  ;;  %v246_v18 = vand.u32 8388607, %v239_v13 }
  0x1b   :  { %v628_v16 = vadd.s32 4294967169, %v243_v14  ;;  %v247_v26 = vor.u32 8388608, %v246_v18 }
  0x1d   :  { %v249_v21 = vadd.s32 1, %v628_v16  ;;  %v875_v34 = vshll.u32 %v247_v26, 8 }
  0x1e   :  { %v853_v17 = vpop.eup %646 }
  0x1f   :  { %v91_v19 = vmul.f32 %v853_v17, %v848_v6  ;;  %v860_v20 = vmax.f32 %v853_v17, 3.75  ;;  %v864_v23 = vpop.eup %648  ;;  %vm250_vm2 = vcmp.gt.s32.totalorder %v249_v21, 0  ;;  %v99_v33 = vmul.f32 0.26666668, %v853_v17 }
  0x20   :  { %v92_v25 = vmul.f32 %v864_v23, %v862_v22  ;;  %v251_v29 = vsel %vm250_vm2, %v249_v21, 0 }
  0x21   :  { %v93_v24 = vmul.f32 %v91_v19, %v848_v6  ;;  %650 = vrcp.f32 %v860_v20  ;;  %v253_v31 = vand.u32 31, %v251_v29  ;;  %vm134_vm3 = vweird.f32 %v860_v20 }
  0x22   :  { %v94_v28 = vmul.f32 %v92_v25, %v862_v22  ;;  %v138_v36 = vand.u32 2147483647, %v860_v20  ;;  %v140_v44 = vand.u32 2147483648, %v860_v20  ;;  %v885_v47 = vshrl.u32 %v251_v29, 5 }
  0x23   :  { %v95_v27 = vadd.f32 %v93_v24, %v843_v2  ;;  %v878_v37 = vsub.s32 32, %v253_v31  ;;  %v256_v39 = vshll.u32 %v798_v38, %v253_v31  ;;  %v259_v41 = vshll.u32 %v799_v40, %v253_v31 }
  0x24   :  { %v96_v32 = vadd.f32 %v94_v28, %v846_v5  ;;  %v262_v46 = vshll.u32 %v800_v45, %v253_v31  ;;  %v265_v53 = vshll.u32 %v801_v51, %v253_v31  ;;  %v896_v56 = vmul.f32 %v99_v33, %v99_v33 }
  0x25   :  { %v97_v30 = vmul.f32 0.5, %v95_v27  ;;  %v257_v48 = vshrl.u32 %v799_v40, %v878_v37  ;;  %v260_v49 = vshrl.u32 %v800_v45, %v878_v37  ;;  %v263_v52 = vshrl.u32 %v801_v51, %v878_v37 }
  0x26   :  { %v98_v42 = vmul.f32 0.5, %v96_v32  ;;  %v266_v55 = vshrl.u32 %v802_v54, %v878_v37  ;;  %v268_v59 = vshll.u32 %v802_v54, %v253_v31  ;;  %v269_v0 = vshrl.u32 %v803_v63, %v878_v37 }
  0x27   :  { %v651_v35 = vpop.eup %650  ;;  %558 = vst [vmem:[#allocation1] ss:$2 sm:$0xff] %v97_v30  ;;  %v898_v57 = vor.u32 %v257_v48, %v256_v39  ;;  %v900_v58 = vor.u32 %v260_v49, %v259_v41  ;;  %v903_v61 = vor.u32 %v263_v52, %v262_v46  ;;  %vm139_vm6 = vcmp.eq.f32.partialorder %v138_v36, 8.507059e+37 }
  0x28   :  { %v130_v43 = vmul.f32 %v651_v35, %v860_v20  ;;  %vm135_vm4 = vweird.f32 %v651_v35  ;;  %560 = vst [vmem:[#allocation1 + $0x10] ss:$2 sm:$0xff] %v98_v42  ;;  %v267_v62 = vor.u32 %v266_v55, %v265_v53  ;;  %v141_v1 = vor.u32 1.1754944e-38, %v140_v44 }
  0x29   :  { %vm136_vm5 = vmor %vm134_vm3, %vm135_vm4  ;;  %vm271_vm7 = vcmp.lt.s32.totalorder %v885_v47, 1  ;;  %vm273_vm8 = vcmp.lt.s32.totalorder %v885_v47, 3  ;;  %v270_v4 = vor.u32 %v269_v0, %v268_v59  ;;  %vm272_vm9 = vcmp.lt.s32.totalorder %v885_v47, 2 }
  0x2a   :  { %v131_v50 = vsub.f32 1.0, %v130_v43  ;;  %vm274_vm10 = vcmp.lt.s32.totalorder %v885_v47, 4  ;;  %v279_v7 = vsel %vm271_vm7, %v898_v57, %v900_v58  ;;  %v283_v14 = vsel %vm271_vm7, %v900_v58, %v903_v61 }
  0x2b   :  { %v280_v8 = vsel %vm274_vm10, %v267_v62, 920167782  ;;  %v103_v15 = vmul.f32 0.0045813, %v896_v56  ;;  %v284_v18 = vsel %vm274_vm10, %v270_v4, 1326507024 }
  0x2c   :  { %v132_v60 = vmul.f32 %v651_v35, %v131_v50  ;;  %v281_v10 = vsel %vm273_vm8, %v903_v61, %v280_v8  ;;  %v288_v19 = vand.u32 65535, %v875_v34  ;;  %v285_v21 = vsel %vm273_vm8, %v267_v62, %v284_v18 }
  0x2d   :  { %v282_v12 = vsel %vm272_vm9, %v279_v7, %v281_v10  ;;  %v289_v24 = vshrl.u32 %v875_v34, 16  ;;  %v286_v27 = vsel %vm272_vm9, %v283_v14, %v285_v21  ;;  %v942_v31 = vmax.f32 %v864_v23, 3.75 }
  0x2e   :  { %v133_v3 = vadd.f32 %v651_v35, %v132_v60  ;;  %v313_v25 = vshrl.u32 %v282_v12, 16  ;;  %v312_v28 = vand.u32 65535, %v282_v12  ;;  %v290_v29 = vand.u32 65535, %v286_v27 }
  0x2f   :  { %v291_v30 = vshrl.u32 %v286_v27, 16  ;;  %v105_v32 = vadd.f32 0.0360768, %v103_v15  ;;  %v396_v36 = vand.u32 2139095040, %v862_v22  ;;  %652 = vrcp.f32 %v942_v31 }
  0x30   :  { %v137_v9 = vsel %vm136_vm5, %v651_v35, %v133_v3  ;;  %v315_v35 = vmul.u32 %v313_v25, %v288_v19  ;;  %v292_v39 = vmul.u32 %v290_v29, %v288_v19  ;;  %v294_v42 = vmul.u32 %v290_v29, %v289_v24 }
  0x31   :  { %v142_v11 = vsel %vm139_vm6, %v141_v1, %v137_v9  ;;  %v293_v41 = vmul.u32 %v291_v30, %v288_v19  ;;  %v314_v44 = vmul.u32 %v312_v28, %v288_v19  ;;  %v316_v46 = vmul.u32 %v312_v28, %v289_v24 }
  0x32   :  { %v930_v16 = vmul.f32 3.75, %v142_v11  ;;  %v318_v48 = vshll.u32 %v315_v35, 16  ;;  %v295_v49 = vmul.u32 %v291_v30, %v289_v24  ;;  %v107_v52 = vmul.f32 %v105_v32, %v896_v56 }
  0x33   :  { %v296_v50 = vshll.u32 %v293_v41, 16  ;;  %v298_v55 = vshll.u32 %v294_v42, 16  ;;  %v397_v59 = vshrl.u32 %v396_v36, 23  ;;  %v255_v60 = vshrl.u32 %v798_v38, %v878_v37 }
  0x34   :  { %v159_v26 = vmul.f32 0.00392377, %v930_v16  ;;  %v317_v0 = vmul.u32 %v313_v25, %v289_v24  ;;  %v804_v3 = vmov 0   ;;  %v320_v7 = vshll.u32 %v316_v46, 16 }
  0x35   :  { %vm300_vm11 = vc.u32 %v292_v39, %v296_v50  ;;  %v302_v62 = vadd.s32 %v296_v50, %v292_v39  ;;  %vm322_vm12 = vc.u32 %v314_v44, %v318_v48  ;;  %v297_v8 = vshrl.u32 %v293_v41, 16  ;;  %v957_v15 = vpop.eup %652 }
  0x36   :  { %v161_v33 = vadd.f32 -0.01647633, %v159_v26  ;;  %v301_v4 = vsel %vm300_vm11, 1, %v804_v3  ;;  %v323_v10 = vsel %vm322_vm12, 1, %v804_v3  ;;  %v276_v37 = vsel %vm274_vm10, %v903_v61, 2102212464 }
  0x37   :  { %v303_v9 = vadd.s32 %v301_v4, %v295_v49  ;;  %vm304_vm13 = vc.u32 %v302_v62, %v298_v55  ;;  %v324_v14 = vadd.s32 %v318_v48, %v314_v44  ;;  %v109_v18 = vadd.f32 0.2659732, %v107_v52 }
  0x38   :  { %v163_v43 = vmul.f32 %v161_v33, %v930_v16  ;;  %v305_v12 = vsel %vm304_vm13, 1, %v804_v3  ;;  %v299_v19 = vshrl.u32 %v294_v42, 16  ;;  %v325_v24 = vadd.s32 %v323_v10, %v317_v0 }
  0x39   :  { %v307_v21 = vadd.s32 %v305_v12, %v303_v9  ;;  %v319_v26 = vshrl.u32 %v315_v35, 16  ;;  %vm326_vm14 = vc.u32 %v324_v14, %v320_v7  ;;  %v275_v27 = vsel %vm271_vm7, %v255_v60, %v898_v57 }
  0x3a   :  { %v165_v53 = vadd.f32 0.02635537, %v163_v43  ;;  %v277_v61 = vsel %vm273_vm8, %v900_v58, %v276_v37  ;;  %v327_v29 = vsel %vm326_vm14, 1, %v804_v3  ;;  %v321_v30 = vshrl.u32 %v316_v46, 16 }
  0x3b   :  { %v308_v28 = vadd.s32 %v307_v21, %v297_v8  ;;  %v329_v32 = vadd.s32 %v327_v29, %v325_v24  ;;  %v145_v33 = vmul.f32 %v957_v15, %v942_v31  ;;  %v631_v36 = vadd.s32 4294967169, %v397_v59 }
  0x3c   :  { %v167_v1 = vmul.f32 %v165_v53, %v930_v16  ;;  %v111_v35 = vmul.f32 %v109_v18, %v896_v56  ;;  %v972_v42 = vadd.s32 %v324_v14, %v320_v7  ;;  %v278_v57 = vsel %vm272_vm9, %v275_v27, %v277_v61 }
  0x3d   :  { %v970_v41 = vadd.s32 %v308_v28, %v299_v19  ;;  %v330_v58 = vadd.s32 %v329_v32, %v319_v26  ;;  %654 = vrsqrt.f32 %v860_v20  ;;  %v146_v44 = vsub.f32 1.0, %v145_v33 }
  0x3e   :  { %v169_v11 = vadd.f32 -0.02057706, %v167_v1  ;;  %v403_v46 = vadd.s32 1, %v631_v36  ;;  %v113_v48 = vadd.f32 1.2067492, %v111_v35  ;;  %v332_v50 = vmul.u32 %v875_v34, %v278_v57 }
  0x3f   :  { %v331_v43 = vadd.s32 %v330_v58, %v321_v30  ;;  %vm334_vm15 = vc.u32 %v970_v41, %v972_v42  ;;  %v147_v55 = vmul.f32 %v957_v15, %v146_v44  ;;  %vm149_vm1 = vweird.f32 %v942_v31 }
  0x40   :  { %v171_v25 = vmul.f32 %v169_v11, %v930_v16  ;;  %v115_v59 = vmul.f32 %v113_v48, %v896_v56  ;;  %vm404_vm0 = vcmp.gt.s32.totalorder %v403_v46, 0  ;;  %vm150_vm2 = vweird.f32 %v957_v15 }
  0x41   :  { %v335_v52 = vadd.s32 1, %v331_v43  ;;  %v988_v34 = vadd.f32 -1.0, %v843_v2  ;;  %v155_v1 = vand.u32 2147483648, %v942_v31  ;;  %v148_v7 = vadd.f32 %v957_v15, %v147_v55  ;;  %vm1000_vm4 = vmor %vm149_vm1, %vm150_vm2 }
  0x42   :  { %v173_v39 = vadd.f32 0.00916281, %v171_v25  ;;  %v153_v8 = vand.u32 2147483647, %v942_v31  ;;  %v405_v9 = vsel %vm404_vm0, %v403_v46, 0  ;;  %vm191_vm13 = vcmp.lt.f32.partialorder %v853_v17, 3.75 }
  0x43   :  { %v336_v53 = vsel %vm334_vm15, %v335_v52, %v331_v43  ;;  %v982_v47 = vpop.eup %654  ;;  %v117_v10 = vadd.f32 3.0899425, %v115_v59  ;;  %v393_v12 = vand.u32 2147483647, %v862_v22  ;;  %v156_v18 = vor.u32 1.1754944e-38, %v155_v1 }
  0x44   :  { %v175_v49 = vmul.f32 %v173_v39, %v930_v16  ;;  %v337_v62 = vadd.s32 %v336_v53, %v332_v50  ;;  %v194_v4 = vmul.f32 %v982_v47, %v860_v20  ;;  %v407_v19 = vand.u32 31, %v405_v9 }
  0x45   :  { %v229_v21 = vmin.f32 %v988_v34, 0.0  ;;  %v152_v25 = vsel %vm1000_vm4, %v957_v15, %v148_v7  ;;  %vm154_vm5 = vcmp.eq.f32.partialorder %v153_v8, 8.507059e+37  ;;  %v119_v26 = vmul.f32 %v117_v10, %v896_v56 }
  0x46   :  { %v177_v60 = vadd.f32 -0.00157565, %v175_v49  ;;  %v338_v0 = vadd.s32 536870912, %v337_v62  ;;  %v195_v24 = vmul.f32 %v982_v47, %v194_v4  ;;  %v400_v28 = vand.u32 8388607, %v393_v12 }
  0x47   :  { %v157_v30 = vsel %vm154_vm5, %v156_v18, %v152_v25  ;;  %v1014_v32 = vsub.s32 32, %v407_v19  ;;  %v1016_v33 = vmul.f32 1.442695, %v229_v21  ;;  %v121_v35 = vadd.f32 3.5156229, %v119_v26 }
  0x48   :  { %v179_v11 = vmul.f32 %v177_v60, %v930_v16  ;;  %v996_v37 = vshrl.u32 %v338_v0, 30  ;;  %v196_v36 = vmul.f32 0.5, %v195_v24  ;;  %v401_v57 = vor.u32 8388608, %v400_v28 }
  0x49   :  { %v1019_v43 = vmul.f32 3.75, %v157_v30  ;;  %v410_v44 = vshll.u32 %v798_v38, %v407_v19  ;;  %v413_v46 = vshll.u32 %v799_v40, %v407_v19  ;;  %v411_v48 = vshrl.u32 %v799_v40, %v1014_v32 }
  0x4a   :  { %v340_v14 = vshll.u32 %v996_v37, 30  ;;  %v181_v27 = vadd.f32 0.00225319, %v179_v11  ;;  %v414_v49 = vshrl.u32 %v800_v45, %v1014_v32  ;;  %v419_v50 = vshll.u32 %v801_v51, %v407_v19 }
  0x4b   :  { %v420_v52 = vshrl.u32 %v802_v54, %v1014_v32  ;;  %v197_v53 = vsub.f32 1.5, %v196_v36  ;;  %vm200_vm7 = vweird.f32 %v982_v47  ;;  %v1031_v59 = vshrl.u32 %v405_v9, 5 }
  0x4c   :  { %v341_v61 = vsub.s32 %v337_v62, %v340_v14  ;;  %v183_v39 = vmul.f32 %v181_v27, %v930_v16  ;;  %v416_v60 = vshll.u32 %v800_v45, %v407_v19  ;;  %v417_v62 = vshrl.u32 %v801_v51, %v1014_v32  ;;  %vm1058_vm12 = vmor %vm134_vm3, %vm200_vm7 }
  0x4d   :  { %v422_v40 = vshll.u32 %v802_v54, %v407_v19  ;;  %v423_v0 = vshrl.u32 %v803_v63, %v1014_v32  ;;  %v333_v4 = vadd.s32 %v972_v42, %v970_v41  ;;  %v160_v7 = vmul.f32 0.00392377, %v1019_v43 }
  0x4e   :  { %vm342_vm6 = vcmp.lt.s32.totalorder %v341_v61, 0  ;;  %v343_v29 = vsub.s32 0, %v341_v61  ;;  %v185_v1 = vadd.f32 0.01328592, %v183_v39  ;;  %v1042_v9 = vor.u32 %v411_v48, %v410_v44 }
  0x4f   :  { %v1044_v10 = vor.u32 %v414_v49, %v413_v46  ;;  %v421_v45 = vor.u32 %v420_v52, %v419_v50  ;;  %vm428_vm9 = vcmp.lt.s32.totalorder %v1031_v59, 4  ;;  %v123_v54 = vmul.f32 %v121_v35, %v896_v56 }
  0x50   :  { %v344_v15 = vsel %vm342_vm6, %v343_v29, %v341_v61  ;;  %v1048_v63 = vor.u32 %v417_v62, %v416_v60  ;;  %v424_v14 = vor.u32 %v423_v0, %v422_v40  ;;  %vm425_vm10 = vcmp.lt.s32.totalorder %v1031_v59, 1 }
  0x51   :  { %v345_v58 = vclz %v344_v15  ;;  %v198_v41 = vmul.f32 %v982_v47, %v197_v53  ;;  %vm427_vm11 = vcmp.lt.s32.totalorder %v1031_v59, 3  ;;  %v187_v19 = vmul.f32 %v185_v1, %v930_v16 }
  0x52   :  { %v162_v56 = vadd.f32 -0.01647633, %v160_v7  ;;  %v434_v24 = vsel %vm428_vm9, %v421_v45, 920167782  ;;  %v1064_v25 = vshll.u32 %v401_v57, 8  ;;  %vm426_vm14 = vcmp.lt.s32.totalorder %v1031_v59, 2 }
  0x53   :  { %v629_v55 = vadd.s32 4294967294, %v345_v58  ;;  %v433_v20 = vsel %vm425_vm10, %v1042_v9, %v1044_v10  ;;  %v100_v16 = vmul.f32 0.26666668, %v864_v23  ;;  %v437_v28 = vsel %vm425_vm10, %v1044_v10, %v1048_v63 }
  0x54   :  { %v438_v29 = vsel %vm428_vm9, %v424_v14, 1326507024  ;;  %v202_v30 = vsel %vm1058_vm12, %v982_v47, %v198_v41  ;;  %v363_v39 = vsub.s32 4, %v996_v37  ;;  %v189_v15 = vadd.f32 0.3989423, %v187_v19 }
  0x55   :  { %vm630_vm8 = vcmp.lt.s32.totalorder %v629_v55, 0  ;;  %v164_v57 = vmul.f32 %v162_v56, %v1019_v43  ;;  %v439_v44 = vsel %vm427_vm11, %v421_v45, %v438_v29  ;;  %v442_v49 = vand.u32 65535, %v1064_v25 }
  0x56   :  { %v348_v8 = vsel %vm630_vm8, 0, %v629_v55  ;;  %v440_v48 = vsel %vm426_vm14, %v437_v28, %v439_v44  ;;  %v443_v47 = vshrl.u32 %v1064_v25, 16  ;;  %v125_v50 = vadd.f32 1.0, %v123_v54 }
  0x57   :  { %v349_v11 = vsub.s32 32, %v348_v8  ;;  %v350_v51 = vshll.u32 %v341_v61, %v348_v8  ;;  %v353_v2 = vsub.s32 4294967266, %v348_v8  ;;  %v435_v61 = vsel %vm427_vm11, %v1048_v63, %v434_v24 }
  0x58   :  { %v436_v58 = vsel %vm426_vm14, %v433_v20, %v435_v61  ;;  %vm1097_vm3 = vcmp.le.f32.partialorder %v239_v13, 0.7853982  ;;  %vm241_vm15 = vcmp.lt.s32.totalorder %v848_v6, 0  ;;  %v1102_v53 = vmul.f32 %v100_v16, %v100_v16 }
  0x59   :  { %v351_v42 = vshrl.u32 %v333_v4, %v349_v11  ;;  %v354_v18 = vadd.s32 127, %v353_v2  ;;  %v364_v60 = vsel %vm241_vm15, %v363_v39, %v996_v37  ;;  %v444_v62 = vand.u32 65535, %v440_v48 }
  0x5a   :  { %v445_v40 = vshrl.u32 %v440_v48, 16  ;;  %v213_v0 = vmul.f32 %v202_v30, %v189_v15  ;;  %v166_v1 = vadd.f32 0.02635537, %v164_v57  ;;  %v466_v4 = vand.u32 65535, %v436_v58 }
  0x5b   :  { %v352_v26 = vor.u32 %v351_v42, %v350_v51  ;;  %v355_v27 = vshll.u32 %v354_v18, 23  ;;  %v467_v7 = vshrl.u32 %v436_v58, 16  ;;  %v446_v13 = vmul.u32 %v444_v62, %v442_v49 }
  0x5c   :  { %v447_v45 = vmul.u32 %v445_v40, %v442_v49  ;;  %v448_v11 = vmul.u32 %v444_v62, %v443_v47  ;;  %656 = vpow2.f32 %v1016_v33  ;;  %v104_v51 = vmul.f32 0.0045813, %v1102_v53 }
  0x5d   :  { %v356_v36 = vor.u32 4788187, %v355_v27  ;;  %v359_v35 = vcvt.s32.f32 %v352_v26  ;;  %v409_v2 = vshrl.u32 %v798_v38, %v1014_v32  ;;  %v469_v54 = vmul.u32 %v467_v7, %v442_v49 }
  0x5e   :  { %v449_v14 = vmul.u32 %v445_v40, %v443_v47  ;;  %v450_v41 = vshll.u32 %v447_v45, 16  ;;  %v452_v42 = vshll.u32 %v448_v11, 16  ;;  %v215_v18 = vsel %vm191_vm13, %v125_v50, %v213_v0 }
  0x5f   :  { %v357_v46 = vand.u32 2147483647, %v356_v36  ;;  %v366_v33 = vsel %vm1097_vm3, 0, %v364_v60  ;;  %v470_v21 = vmul.u32 %v466_v4, %v443_v47  ;;  %v168_v38 = vmul.f32 %v166_v1, %v1019_v43 }
  0x60   :  { %vm454_vm0 = vc.u32 %v446_v13, %v450_v41  ;;  %v456_v32 = vadd.s32 %v450_v41, %v446_v13  ;;  %v451_v24 = vshrl.u32 %v447_v45, 16  ;;  %v468_v27 = vmul.u32 %v466_v4, %v442_v49 }
  0x61   :  { %v360_v55 = vmul.f32 %v359_v35, %v357_v46  ;;  %v455_v26 = vsel %vm454_vm0, 1, %v804_v3  ;;  %v472_v20 = vshll.u32 %v469_v54, 16  ;;  %658 = vlog2.f32 %v215_v18 }
  0x62   :  { %v457_v28 = vadd.s32 %v455_v26, %v449_v14  ;;  %vm458_vm2 = vc.u32 %v456_v32, %v452_v42  ;;  %v657_v29 = vpop.eup %656  ;;  %v471_v36 = vmul.u32 %v467_v7, %v443_v47  ;;  %v474_v35 = vshll.u32 %v470_v21, 16 }
  0x63   :  { %v361_v8 = vxor.u32 2147483648, %v360_v55  ;;  %v459_v30 = vsel %vm458_vm2, 1, %v804_v3  ;;  %v170_v57 = vadd.f32 -0.02057706, %v168_v38  ;;  %v430_v44 = vsel %vm428_vm9, %v1048_v63, 2102212464 }
  0x64   :  { %v461_v58 = vadd.s32 %v459_v30, %v457_v28  ;;  %v453_v46 = vshrl.u32 %v448_v11, 16  ;;  %vm476_vm4 = vc.u32 %v468_v27, %v472_v20  ;;  %v478_v48 = vadd.s32 %v472_v20, %v468_v27 }
  0x65   :  { %v362_v37 = vsel %vm241_vm15, %v361_v8, %v360_v55  ;;  %v477_v55 = vsel %vm476_vm4, 1, %v804_v3  ;;  %v429_v47 = vsel %vm425_vm10, %v409_v2, %v1042_v9  ;;  %v473_v60 = vshrl.u32 %v469_v54, 16 }
  0x66   :  { %v365_v19 = vsel %vm1097_vm3, %v848_v6, %v362_v37  ;;  %v462_v52 = vadd.s32 %v461_v58, %v451_v24  ;;  %v479_v62 = vadd.s32 %v477_v55, %v471_v36  ;;  %vm480_vm5 = vc.u32 %v478_v48, %v474_v35  ;;  %v1150_v58 = vld.sshfl [vmem:[#allocation1] sm:$0xff pattern:$0x75316420] }
  0x67   :  { %v367_v56 = vmul.f32 %v365_v19, %v365_v19  ;;  %v431_v63 = vsel %vm427_vm11, %v1044_v10, %v430_v44  ;;  %v481_v1 = vsel %vm480_vm5, 1, %v804_v3  ;;  %v659_v4 = vpop.eup %658  ;;  %v383_v7 = vand.u32 3, %v366_v33 }
  0x68   :  { %v106_v8 = vadd.f32 0.0360768, %v104_v51  ;;  %v475_v13 = vshrl.u32 %v470_v21, 16  ;;  %v483_v45 = vadd.s32 %v481_v1, %v479_v62  ;;  %v463_v14 = vadd.s32 %v462_v52, %v453_v46  ;;  %v1153_v46 = vld.sshfl [vmem:[#allocation1 + $0x8] sm:$0xff pattern:$0x75316420] }
  0x69   :  { %v368_v16 = vmul.f32 -0.001358992, %v367_v56  ;;  %v375_v61 = vmul.f32 -0.00019511016, %v367_v56  ;;  %v482_v9 = vadd.s32 %v478_v48, %v474_v35  ;;  %v172_v2 = vmul.f32 %v170_v57, %v1019_v43 }
  0x6a   :  { %v432_v54 = vsel %vm426_vm14, %v429_v47, %v431_v63  ;;  %v484_v41 = vadd.s32 %v483_v45, %v473_v60  ;;  %vm388_vm6 = vcmp.eq.s32.totalorder %v383_v7, 2  ;;  %v108_v3 = vmul.f32 %v106_v8, %v1102_v53 }
  0x6b   :  { %v369_v39 = vadd.f32 0.041655596, %v368_v16  ;;  %v376_v15 = vadd.f32 0.008332121, %v375_v61  ;;  %v486_v21 = vmul.u32 %v1064_v25, %v432_v54  ;;  %vm488_vm7 = vc.u32 %v463_v14, %v482_v9 }
  0x6c   :  { %v485_v10 = vadd.s32 %v484_v41, %v475_v13  ;;  %vm385_vm8 = vcmp.eq.s32.totalorder %v383_v7, 0  ;;  %v174_v38 = vadd.f32 0.00916281, %v172_v2  ;;  %v221_v59 = vsel %vm191_vm13, 0.0, %v853_v17 }
  0x6d   :  { %v370_v49 = vmul.f32 %v369_v39, %v367_v56  ;;  %v377_v50 = vmul.f32 %v376_v15, %v367_v56  ;;  %vm384_vm9 = vcmp.lt.s32.totalorder %v383_v7, 2  ;;  %vm382_vm10 = vweird.f32 %v848_v6 }
  0x6e   :  { %v489_v32 = vadd.s32 1, %v485_v10  ;;  %vm227_vm11 = vcmp.gt.f32.partialorder %v988_v34, 0.0  ;;  %v110_v28 = vadd.f32 0.2659732, %v108_v3  ;;  %v176_v30 = vmul.f32 %v174_v38, %v1019_v43 }
  0x6f   :  { %v371_v40 = vadd.f32 -0.4999988, %v370_v49  ;;  %v378_v0 = vadd.f32 -0.16666654, %v377_v50  ;;  %660 = vrsqrt.f32 %v942_v31  ;;  %v487_v8 = vadd.s32 %v482_v9, %v463_v14 }
  0x70   :  { %v490_v27 = vsel %vm488_vm7, %v489_v32, %v485_v10  ;;  %v178_v44 = vadd.f32 -0.00157565, %v176_v30  ;;  %vm395_vm15 = vcmp.lt.s32.totalorder %v862_v22, 0  ;;  %vm1168_vm0 = vcmp.le.f32.partialorder %v393_v12, 0.7853982 }
  0x71   :  { %v372_v11 = vmul.f32 %v371_v40, %v367_v56  ;;  %v379_v37 = vmul.f32 %v378_v0, %v367_v56  ;;  %v218_v56 = vmul.f32 0.6931472, %v659_v4  ;;  %v491_v25 = vadd.s32 %v490_v27, %v486_v21 }
  0x72   :  { %v553_v12 = vlaneseq  ;;  %vm600_vm5 = vcmask 1043456  }
  0x73   :  { %v373_v42 = vadd.f32 1.0, %v372_v11  ;;  %v380_v18 = vadd.f32 1.0, %v379_v37  ;;  %v223_v16 = vadd.f32 %v221_v59, %v218_v56  ;;  %v492_v35 = vadd.s32 536870912, %v491_v25 }
  0x75   :  { %v381_v33 = vmul.f32 %v380_v18, %v365_v19  ;;  %v389_v51 = vxor.u32 2147483648, %v373_v42  ;;  %v626_v19 = vadd.f32 -1.0, %v657_v29  ;;  %v1148_v6 = vshrl.u32 %v492_v35, 30  ;;  %v661_v50 = vpop.eup %660 }
  0x76   :  { %v112_v29 = vmul.f32 %v110_v28, %v1102_v53  ;;  %v204_v47 = vmul.f32 %v661_v50, %v942_v31  ;;  %vm210_vm14 = vweird.f32 %v661_v50  ;;  %v625_v31 = vadd.f32 -1.0, %v846_v5 }
  0x77   :  { %v386_v24 = vxor.u32 2147483648, %v381_v33  ;;  %v390_v26 = vsel %vm388_vm6, %v389_v51, %v381_v33  ;;  %v237_v15 = vsel %vm227_vm11, %v988_v34, %v626_v19  ;;  %v494_v48 = vshll.u32 %v1148_v6, 30  ;;  %vm211_vm3 = vmor %vm149_vm1, %vm210_vm14 }
  0x78   :  { %v114_v55 = vadd.f32 1.2067492, %v112_v29  ;;  %v205_v63 = vmul.f32 %v661_v50, %v204_v47  ;;  %v517_v28 = vsub.s32 4, %v1148_v6  ;;  %vm192_vm1 = vcmp.lt.f32.partialorder %v864_v23, 3.75 }
  0x79   :  { %v387_v20 = vsel %vm385_vm8, %v373_v42, %v386_v24  ;;  %v495_v52 = vsub.s32 %v491_v25, %v494_v48  ;;  %v581_v25 = vld [vmem:[#allocation8] sm:$0x77]  ;;  %v230_v35 = vmin.f32 %v625_v31, 0.0  ;;  %v554_v29 = vshrl.u32 %v553_v12, 7 }
  0x7a   :  { %v391_v61 = vsel %vm384_vm9, %v387_v20, %v390_v26  ;;  %v116_v62 = vmul.f32 %v114_v55, %v1102_v53  ;;  %v206_v45 = vmul.f32 0.5, %v205_v63  ;;  %vm536_vm8 = vweird.f32 %v862_v22 }
  0x7b   :  { %v392_v36 = vsel %vm382_vm10, nan, %v391_v61  ;;  %vm496_vm12 = vcmp.lt.s32.totalorder %v495_v52, 0  ;;  %v497_v34 = vsub.s32 0, %v495_v52  ;;  %vm555_vm2 = vcmp.lt.s32.totalorder %v554_v29, 2 }
  0x7c   :  { %v547_v39 = vmul.f32 %v853_v17, %v392_v36  ;;  %v180_v17 = vmul.f32 %v178_v44, %v1019_v43  ;;  %v118_v4 = vadd.f32 3.0899425, %v116_v62  ;;  %v207_v3 = vsub.f32 1.5, %v206_v45 }
  0x7d   :  { %v498_v60 = vsel %vm496_vm12, %v497_v34, %v495_v52  ;;  %vm228_vm9 = vcmp.gt.f32.partialorder %v625_v31, 0.0 }
  0x7e   :  { %v549_v57 = vsub.f32 %v223_v16, %v547_v39  ;;  %v182_v40 = vadd.f32 0.00225319, %v180_v17  ;;  %v499_v0 = vclz %v498_v60  ;;  %v120_v54 = vmul.f32 %v118_v4, %v1102_v53 }
  0x7f   :  { %v208_v9 = vmul.f32 %v661_v50, %v207_v3 }
  0x80   :  { %v551_v49 = vadd.f32 %v549_v57, %v237_v15  ;;  %v632_v1 = vadd.s32 4294967294, %v499_v0  ;;  %v184_v7 = vmul.f32 %v182_v40, %v1019_v43  ;;  %v122_v51 = vadd.f32 3.5156229, %v120_v54 }
  0x81   :  { %v212_v19 = vsel %vm211_vm3, %v661_v50, %v208_v9  ;;  %v518_v57 = vsel %vm395_vm15, %v517_v28, %v1148_v6  ;;  %v563_v9 = vld.sshfl [vmem:[#allocation1 + $0x10] sm:$0xff pattern:$0x75316420] }
  0x82   :  { %569 = vst [vmem:[#allocation1] ss:$2 sm:$0xff] %v551_v49  ;;  %vm633_vm13 = vcmp.lt.s32.totalorder %v632_v1, 0  ;;  %v186_v41 = vadd.f32 0.01328592, %v184_v7  ;;  %v124_v32 = vmul.f32 %v122_v51, %v1102_v53  ;;  %v520_v50 = vsel %vm1168_vm0, 0, %v518_v57 }
  0x83   :  { %v502_v13 = vsel %vm633_vm13, 0, %v632_v1  ;;  %v233_v49 = vmul.f32 1.442695, %v230_v35  ;;  %v537_v47 = vand.u32 3, %v520_v50 }
  0x84   :  { %v503_v11 = vsub.s32 32, %v502_v13  ;;  %v504_v37 = vshll.u32 %v495_v52, %v502_v13  ;;  %v507_v2 = vsub.s32 4294967266, %v502_v13  ;;  %v188_v21 = vmul.f32 %v186_v41, %v1019_v43 }
  0x85   :  { %v126_v16 = vadd.f32 1.0, %v124_v32  ;;  %vm542_vm4 = vcmp.eq.s32.totalorder %v537_v47, 2  ;;  %vm539_vm6 = vcmp.eq.s32.totalorder %v537_v47, 0  ;;  %vm538_vm7 = vcmp.lt.s32.totalorder %v537_v47, 2  ;;  %v582_v32 = vld [vmem:[#allocation8 + $0x8] sm:$0x7] }
  0x86   :  { %v505_v42 = vshrl.u32 %v487_v8, %v503_v11  ;;  %v508_v18 = vadd.s32 127, %v507_v2  ;;  %v190_v59 = vadd.f32 0.3989423, %v188_v21 }
  0x88   :  { %v506_v10 = vor.u32 %v505_v42, %v504_v37  ;;  %v509_v33 = vshll.u32 %v508_v18, 23  ;;  %v214_v61 = vmul.f32 %v212_v19, %v190_v59 }
  0x89   :  { %v572_v26 = vld.sshfl [vmem:[#allocation1] sm:$0xff pattern:$0x75316420]  ;;  %v573_v27 = vld.sshfl [vmem:[#allocation1 + $0x8] sm:$0xff pattern:$0x75316420] }
  0x8a   :  { %v510_v56 = vor.u32 4788187, %v509_v33  ;;  %v513_v14 = vcvt.s32.f32 %v506_v10  ;;  %585 = vst [vmem:[#allocation1] ss:$2 sm:$0xff] %v581_v25  ;;  %v216_v5 = vsel %vm192_vm1, %v126_v16, %v214_v61  ;;  %v579_v6 = vsel %vm555_vm2, %v1153_v46, %v573_v27 }
  0x8b   :  { %662 = vlog2.f32 %v216_v5  ;;  %v578_v8 = vsel %vm555_vm2, %v1150_v58, %v572_v26  ;;  %v222_v46 = vsel %vm192_vm1, 0.0, %v864_v23 }
  0x8c   :  { %v511_v38 = vand.u32 2147483647, %v510_v56  ;;  %664 = vpow2.f32 %v233_v49 }
  0x8e   :  { %v514_v24 = vmul.f32 %v513_v14, %v511_v38 }
  0x90   :  { %v515_v20 = vxor.u32 2147483648, %v514_v24 }
  0x91   :  { %v588_v40 = vld.sshfl [vmem:[#allocation1] sm:$0xff pattern:$0x75316420]  ;;  %v589_v0 = vld.sshfl [vmem:[#allocation1 + $0x8] sm:$0xff pattern:$0x75316420]  ;;  %v663_v1 = vpop.eup %662 }
  0x92   :  { %v516_v53 = vsel %vm395_vm15, %v515_v20, %v514_v24  ;;  %v595_v63 = vmul.f32 %v589_v0, %v579_v6  ;;  %v594_v13 = vmul.f32 %v588_v40, %v578_v8  ;;  %v665_v2 = vpop.eup %664  ;;  %v220_v54 = vmul.f32 0.6931472, %v663_v1 }
  0x93   :  { %v519_v30 = vsel %vm1168_vm0, %v862_v22, %v516_v53  ;;  %v627_v58 = vadd.f32 -1.0, %v665_v2 }
  0x94   :  { %v521_v36 = vmul.f32 %v519_v30, %v519_v30  ;;  %v599_v45 = vrot.slane %v595_v63, 4  ;;  %v224_v10 = vadd.f32 %v222_v46, %v220_v54 }
  0x95   :  { %v238_v56 = vsel %vm228_vm9, %v625_v31, %v627_v58 }
  0x96   :  { %v522_v39 = vmul.f32 -0.001358992, %v521_v36  ;;  %v529_v15 = vmul.f32 -0.00019511016, %v521_v36  ;;  %v601_v41 = vsel %vm600_vm5, %v594_v13, %v599_v45 }
  0x97   :  { %603 = vst [vmem:[#allocation10] sm:$0x77] %v601_v41 }
  0x98   :  { %v523_v44 = vadd.f32 0.041655596, %v522_v39  ;;  %v530_v48 = vadd.f32 0.008332121, %v529_v15 }
  0x9a   :  { %v524_v52 = vmul.f32 %v523_v44, %v521_v36  ;;  %v531_v55 = vmul.f32 %v530_v48, %v521_v36 }
  0x9c   :  { %v525_v17 = vadd.f32 -0.4999988, %v524_v52  ;;  %v532_v34 = vadd.f32 -0.16666654, %v531_v55 }
  0x9e   :  { %v526_v60 = vmul.f32 %v525_v17, %v521_v36  ;;  %v533_v62 = vmul.f32 %v532_v34, %v521_v36 }
  0xa0   :  { %v527_v4 = vadd.f32 1.0, %v526_v60  ;;  %v534_v7 = vadd.f32 1.0, %v533_v62 }
  0xa2   :  { %v535_v11 = vmul.f32 %v534_v7, %v519_v30  ;;  %v543_v37 = vxor.u32 2147483648, %v527_v4 }
  0xa4   :  { %v540_v42 = vxor.u32 2147483648, %v535_v11  ;;  %v544_v18 = vsel %vm542_vm4, %v543_v37, %v535_v11 }
  0xa6   :  { %v541_v3 = vsel %vm539_vm6, %v527_v4, %v540_v42 }
  0xa7   :  { %v545_v33 = vsel %vm538_vm7, %v541_v3, %v544_v18 }
  0xa8   :  { %v546_v51 = vsel %vm536_vm8, nan, %v545_v33 }
  0xa9   :  { %v548_v21 = vmul.f32 %v864_v23, %v546_v51 }
  0xab   :  { %v550_v14 = vsub.f32 %v224_v10, %v548_v21 }
  0xad   :  { %v552_v38 = vadd.f32 %v550_v14, %v238_v56 }
  0xaf   :  { %571 = vst [vmem:[#allocation1 + $0x10] ss:$2 sm:$0xff] %v552_v38 }
  0xb6   :  { %v574_v59 = vld.sshfl [vmem:[#allocation1 + $0x10] sm:$0xff pattern:$0x75316420] }
  0xb7   :  { %587 = vst [vmem:[#allocation1 + $0x10] ss:$2 sm:$0xff] %v582_v32  ;;  %v580_v22 = vsel %vm555_vm2, %v563_v9, %v574_v59 }
  0xbe   :  { %v590_v24 = vld.sshfl [vmem:[#allocation1 + $0x10] sm:$0xff pattern:$0x75316420] }
  0xbf   :  { %v596_v26 = vmul.f32 %v590_v24, %v580_v22 }
  0xc1   :  { %604 = vst [vmem:[#allocation10 + $0x8] sm:$0x7] %v596_v26 }
  0xc2   :  { %615 = dma.vmem_to_hbm [thread:$0]  %s611_s3, 192, %s613_s9, [#allocation4]  }
  0xc3   :  { %792 = dma.done.wait [#allocation4], 192  }
  0xc4   :  { %793 = vsyncadd [#allocation4], 4294967104 }
  0xc5   :  { %620 = vsyncpa [#allocation3], 1 }
  0xc6   :  { %621 = vsyncpa [#allocation6], 1 }
  0xc7   :  { %622 = vsyncpa [#allocation9], 1 }
  0xc8   :  { %623 = vsyncpa [#allocation4], 1 }

</bundles_post_ra>
